<compile_context>
chip_gen: v6e
topology: v6e:2x2x1
jax: 0.10.0
libtpu: 0.0.40
codegen_flags: <defaults>
</compile_context>

<pallas_src>
import jax
import jax.numpy as jnp
from jax.experimental import pallas as pl
from jax.experimental.pallas import tpu as pltpu


def _round_up(n, m):
    return (n + m - 1) // m * m


def _vmem_capacity_bytes():
    """Physical VMEM of the current chip; conservative 64 MiB fallback (v7x/TC)."""
    try:
        return int(pltpu.get_tpu_info().vmem_capacity_bytes)
    except Exception:
        return 64 * 1024 * 1024


def _mlp_kernel(x_ref, w1_ref, b1_ref, w2_ref, b2_ref, w3_ref, b3_ref, o_ref):
    cdt = w1_ref.dtype  # MXU operand dtype (bf16 by default); accumulation is f32
    # layer1: Linear + ReLU  (x stays f32 in HBM; cast rides the VPU slot)
    h1 = jnp.dot(x_ref[...].astype(cdt), w1_ref[...],
                 preferred_element_type=jnp.float32)
    h1 = jnp.maximum(h1 + b1_ref[...], 0.0)
    # layer2: Linear + ReLU
    h2 = jnp.dot(h1.astype(cdt), w2_ref[...], preferred_element_type=jnp.float32)
    h2 = jnp.maximum(h2 + b2_ref[...], 0.0)
    # layer3: Linear (no activation)
    y = jnp.dot(h2.astype(cdt), w3_ref[...], preferred_element_type=jnp.float32)
    o_ref[...] = (y + b3_ref[...]).astype(o_ref.dtype)


def pack_params(params, compute_dtype=jnp.bfloat16):
    """One-time packing: pad feature dims to multiples of 128 (lane-dense) and
    cast weights to the MXU operand dtype. Zero padding is exact (zero rows/cols
    contribute nothing, ReLU(0)=0). Call once, reuse the result every forward."""
    in_dim, h1 = params["w1"].shape
    h2 = params["w2"].shape[1]
    out_dim = params["w3"].shape[1]
    in_p, h1_p, h2_p, out_p = (_round_up(d, 128) for d in (in_dim, h1, h2, out_dim))

    def pad2(a, rows, cols, dtype):
        a = a.astype(dtype)
        pr, pc = rows - a.shape[0], cols - a.shape[1]
        if pr or pc:
            a = jnp.pad(a, ((0, pr), (0, pc)))
        return a

    return {
        "_packed": True,
        "dims": (in_dim, h1, h2, out_dim),
        "pdims": (in_p, h1_p, h2_p, out_p),
        "compute_dtype": compute_dtype,
        "w1": pad2(params["w1"], in_p, h1_p, compute_dtype),
        "b1": pad2(params["b1"], 1, h1_p, jnp.float32),
        "w2": pad2(params["w2"], h1_p, h2_p, compute_dtype),
        "b2": pad2(params["b2"], 1, h2_p, jnp.float32),
        "w3": pad2(params["w3"], h2_p, out_p, compute_dtype),
        "b3": pad2(params["b3"], 1, out_p, jnp.float32),
    }


def activation_net_forward(x, params, *, batch_tile=None, out_dtype=None):
    """Fused 3-layer MLP (Linear+ReLU, Linear+ReLU, Linear) as one Pallas kernel.

    x: (B, in_dim) float32
    params: raw dict (w1 (in,h1), b1 (1,h1), w2 (h1,h2), b2 (1,h2), w3 (h2,out),
            b3 (1,out)) or the output of pack_params() (preferred: packs once).
    """
    if not (isinstance(params, dict) and params.get("_packed", False)):
        params = pack_params(params)

    B, in_dim = x.shape
    p_in, _h1, _h2, out_dim = params["dims"]
    assert in_dim == p_in, "x feature dim does not match packed params"
    in_p, h1_p, h2_p, out_p = params["pdims"]
    compute_dtype = params["compute_dtype"]
    out_dtype = out_dtype or x.dtype

    vmem_cap = _vmem_capacity_bytes()
    is_v7x_like = vmem_cap <= (64 << 20)  # 64 MiB/TC => v7x-class chip

    # --- batch tiling ------------------------------------------------------
    # Fixed-size tile (~256 rows) once B is large: >=2-4 grid steps so the
    # BlockSpec pipeline has a steady state and the v7x parallel axis gives
    # each core multiple steps. Prefer a tile that divides B exactly so no
    # batch padding / output-slice copy is needed.
    if batch_tile is None:
        if B <= 256:
            batch_tile = _round_up(B, 8)
        else:
            batch_tile = 256
            if B % 256 != 0:
                for cand in (320, 192, 288, 224, 352, 160, 384, 128):
                    if B % cand == 0:
                        batch_tile = cand
                        break
    batch_tile = max(8, _round_up(batch_tile, 8))
    B_p = _round_up(B, batch_tile)
    steps = B_p // batch_tile
    # v7x: keep the parallel step count even so both TensorCores do equal work.
    if is_v7x_like and steps > 1 and steps % 2 == 1:
        B_p += batch_tile
        steps += 1
    grid = (steps,)

    # --- VMEM budget & limits ----------------------------------------------
    cbytes = jnp.dtype(compute_dtype).itemsize
    xbytes = jnp.dtype(x.dtype).itemsize
    obytes = jnp.dtype(out_dtype).itemsize
    weight_bytes = (in_p * h1_p + h1_p * h2_p + h2_p * out_p) * cbytes
    bias_bytes = (h1_p + h2_p + out_p) * 4
    vmem_budget = (
        2 * batch_tile * in_p * xbytes          # double-buffered x tile (f32)
        + 2 * batch_tile * out_p * obytes       # double-buffered out tile
        + weight_bytes + bias_bytes             # single-buffered constants
        + batch_tile * (h1_p + h2_p) * 4        # f32 intermediates h1, h2
        + batch_tile * (in_p + h1_p + h2_p) * cbytes  # bf16 operand casts
    )
    # Per-generation ceiling: physical VMEM minus headroom (128 MiB v5e/v6e,
    # 64 MiB v7x). No double-counting of the single-buffered weights.
    vmem_ceiling = max(32 << 20, vmem_cap - (16 << 20))
    vmem_limit = int(max(32 << 20, min(vmem_ceiling, vmem_budget + (4 << 20))))
    # TODO(synk): if weight_bytes + intermediates exceed ~vmem_ceiling (earlier,
    # ~48 MiB, on v7x), add a K-reduction grid axis ("arbitrary") with an f32
    # scratch accumulator per layer instead of one full-weight block.

    flops = 2 * B_p * (in_p * h1_p + h1_p * h2_p + h2_p * out_p)
    bytes_accessed = (B_p * in_p * xbytes + weight_bytes + bias_bytes
                      + B_p * out_p * obytes)

    # --- inputs: avoid wrapper-side pad/cast of x unless actually needed ----
    xp = x
    if B_p != B or in_p != in_dim:
        xp = jnp.pad(x, ((0, B_p - B), (0, in_p - in_dim)))

    def const_spec(shape):
        # Constant index_map => fetched once; single-buffer to halve its VMEM.
        return pl.BlockSpec(shape, lambda i: (0, 0), pipeline_mode=pl.Buffered(1))

    out_padded = pl.pallas_call(
        _mlp_kernel,
        out_shape=jax.ShapeDtypeStruct((B_p, out_p), out_dtype),
        grid_spec=pl.GridSpec(
            grid=grid,
            in_specs=[
                pl.BlockSpec((batch_tile, in_p), lambda i: (i, 0)),
                const_spec((in_p, h1_p)),
                const_spec((1, h1_p)),
                const_spec((h1_p, h2_p)),
                const_spec((1, h2_p)),
                const_spec((h2_p, out_p)),
                const_spec((1, out_p)),
            ],
            out_specs=pl.BlockSpec((batch_tile, out_p), lambda i: (i, 0)),
        ),
        compiler_params=pltpu.CompilerParams(
            dimension_semantics=("parallel",),
            vmem_limit_bytes=vmem_limit,
        ),
        cost_estimate=pl.CostEstimate(
            flops=flops, transcendentals=0, bytes_accessed=bytes_accessed),
    )(xp, params["w1"], params["b1"], params["w2"], params["b2"],
      params["w3"], params["b3"])

    if B_p != B or out_p != out_dim:
        return out_padded[:B, :out_dim]
    return out_padded


def init_params(key, in_dim, n_hidden_1, n_hidden_2, out_dim, dtype=jnp.float32):
    """Deterministic init mimicking nn.Linear's uniform(-1/sqrt(fan_in), 1/sqrt(fan_in))."""
    ks = jax.random.split(key, 6)

    def lin(kw, kb, fan_in, fan_out):
        bound = 1.0 / jnp.sqrt(fan_in)
        # stored as (fan_in, fan_out) == transpose of PyTorch's (fan_out, fan_in)
        w = jax.random.uniform(kw, (fan_in, fan_out), dtype, -bound, bound)
        b = jax.random.uniform(kb, (1, fan_out), dtype, -bound, bound)
        return w, b

    w1, b1 = lin(ks[0], ks[1], in_dim, n_hidden_1)
    w2, b2 = lin(ks[2], ks[3], n_hidden_1, n_hidden_2)
    w3, b3 = lin(ks[4], ks[5], n_hidden_2, out_dim)
    return {"w1": w1, "b1": b1, "w2": w2, "b2": b2, "w3": w3, "b3": b3}


def reference_forward(x, p, compute_dtype=None):
    def cast(a):
        return a.astype(compute_dtype) if compute_dtype is not None else a

    h1 = jnp.maximum(
        jnp.dot(cast(x), cast(p["w1"]), preferred_element_type=jnp.float32) + p["b1"], 0.0)
    h2 = jnp.maximum(
        jnp.dot(cast(h1), cast(p["w2"]), preferred_element_type=jnp.float32) + p["b2"], 0.0)
    return jnp.dot(cast(h2), cast(p["w3"]), preferred_element_type=jnp.float32) + p["b3"]


if __name__ == "__main__":
    # small shapes consistent with the module: batch=8, in=32, h1=64, h2=64, out=16
    B, IN_DIM, H1, H2, OUT_DIM = 8, 32, 64, 64, 16

    key = jax.random.PRNGKey(0)
    k_x, k_p = jax.random.split(key)
    x = jax.random.normal(k_x, (B, IN_DIM), jnp.float32)
    params = init_params(k_p, IN_DIM, H1, H2, OUT_DIM)

    packed = pack_params(params)            # pad + bf16-cast weights once
    y = activation_net_forward(x, packed)
    y = jax.block_until_ready(y)
    assert y.shape == (B, OUT_DIM)

    # matched-quantization reference (same bf16 operand rounding, f32 accum)
    y_ref_q = reference_forward(x, params, compute_dtype=jnp.bfloat16)
    assert jnp.allclose(y, y_ref_q, atol=5e-3, rtol=5e-3), "mismatch vs bf16 reference"

    # full-f32 reference: looser tolerance accounts for bf16 operand quantization
    y_ref = reference_forward(x, params)
    assert jnp.allclose(y, y_ref, atol=5e-2, rtol=5e-2), "mismatch vs f32 reference"

    print("KERNEL_OK")
</pallas_src>

<mosaic_0001>
module attributes {stable_mosaic.version = 11 : i64} {
  func.func @_mlp_kernel(%arg0: i32, %arg1: memref<8x128xf32, #tpu.memory_space<vmem>>, %arg2: memref<128x128xbf16, #tpu.memory_space<vmem>>, %arg3: memref<1x128xf32, #tpu.memory_space<vmem>>, %arg4: memref<128x128xbf16, #tpu.memory_space<vmem>>, %arg5: memref<1x128xf32, #tpu.memory_space<vmem>>, %arg6: memref<128x128xbf16, #tpu.memory_space<vmem>>, %arg7: memref<1x128xf32, #tpu.memory_space<vmem>>, %arg8: memref<8x128xf32, #tpu.memory_space<vmem>>) attributes {dimension_semantics = [#tpu.dimension_semantics<parallel>], iteration_bounds = array<i64: 1>, scalar_prefetch = 0 : i64, scratch_operands = 0 : i64, tpu.core_type = #tpu.core_type<tc>, window_params = [{transform_indices = @transform_0, window_bounds = array<i64: 8, 128>}, {pipeline_mode = #tpu.pipeline_mode<synchronous>, transform_indices = @transform_1, window_bounds = array<i64: 128, 128>}, {pipeline_mode = #tpu.pipeline_mode<synchronous>, transform_indices = @transform_2, window_bounds = array<i64: 1, 128>}, {pipeline_mode = #tpu.pipeline_mode<synchronous>, transform_indices = @transform_3, window_bounds = array<i64: 128, 128>}, {pipeline_mode = #tpu.pipeline_mode<synchronous>, transform_indices = @transform_4, window_bounds = array<i64: 1, 128>}, {pipeline_mode = #tpu.pipeline_mode<synchronous>, transform_indices = @transform_5, window_bounds = array<i64: 128, 128>}, {pipeline_mode = #tpu.pipeline_mode<synchronous>, transform_indices = @transform_6, window_bounds = array<i64: 1, 128>}, {transform_indices = @transform_7, window_bounds = array<i64: 8, 128>}]} {
    %c0 = arith.constant 0 : index
    %c0_0 = arith.constant 0 : index
    %0 = vector.load %arg1[%c0, %c0_0] : memref<8x128xf32, #tpu.memory_space<vmem>>, vector<8x128xf32>
    %1 = arith.truncf %0 : vector<8x128xf32> to vector<8x128xbf16>
    %c0_1 = arith.constant 0 : index
    %c0_2 = arith.constant 0 : index
    %2 = vector.load %arg2[%c0_1, %c0_2] : memref<128x128xbf16, #tpu.memory_space<vmem>>, vector<128x128xbf16>
    %cst = arith.constant dense<0.000000e+00> : vector<8x128xf32>
    %3 = tpu.matmul %1, %2, %cst {dimension_numbers = #tpu.dot_dimension_numbers<[1], [0], [0], [1], [0, 0, 1, 1], [], []>} : vector<8x128xbf16>, vector<128x128xbf16>, vector<8x128xf32> -> vector<8x128xf32>
    %c0_3 = arith.constant 0 : index
    %c0_4 = arith.constant 0 : index
    %4 = vector.load %arg3[%c0_3, %c0_4] : memref<1x128xf32, #tpu.memory_space<vmem>>, vector<1x128xf32>
    %5 = vector.broadcast %4 : vector<1x128xf32> to vector<8x128xf32>
    %6 = arith.addf %3, %5 : vector<8x128xf32>
    %cst_5 = arith.constant 0.000000e+00 : f32
    %7 = vector.broadcast %cst_5 : f32 to vector<8x128xf32>
    %8 = arith.maximumf %6, %7 : vector<8x128xf32>
    %9 = arith.truncf %8 : vector<8x128xf32> to vector<8x128xbf16>
    %c0_6 = arith.constant 0 : index
    %c0_7 = arith.constant 0 : index
    %10 = vector.load %arg4[%c0_6, %c0_7] : memref<128x128xbf16, #tpu.memory_space<vmem>>, vector<128x128xbf16>
    %cst_8 = arith.constant dense<0.000000e+00> : vector<8x128xf32>
    %11 = tpu.matmul %9, %10, %cst_8 {dimension_numbers = #tpu.dot_dimension_numbers<[1], [0], [0], [1], [0, 0, 1, 1], [], []>} : vector<8x128xbf16>, vector<128x128xbf16>, vector<8x128xf32> -> vector<8x128xf32>
    %c0_9 = arith.constant 0 : index
    %c0_10 = arith.constant 0 : index
    %12 = vector.load %arg5[%c0_9, %c0_10] : memref<1x128xf32, #tpu.memory_space<vmem>>, vector<1x128xf32>
    %13 = vector.broadcast %12 : vector<1x128xf32> to vector<8x128xf32>
    %14 = arith.addf %11, %13 : vector<8x128xf32>
    %cst_11 = arith.constant 0.000000e+00 : f32
    %15 = vector.broadcast %cst_11 : f32 to vector<8x128xf32>
    %16 = arith.maximumf %14, %15 : vector<8x128xf32>
    %17 = arith.truncf %16 : vector<8x128xf32> to vector<8x128xbf16>
    %c0_12 = arith.constant 0 : index
    %c0_13 = arith.constant 0 : index
    %18 = vector.load %arg6[%c0_12, %c0_13] : memref<128x128xbf16, #tpu.memory_space<vmem>>, vector<128x128xbf16>
    %cst_14 = arith.constant dense<0.000000e+00> : vector<8x128xf32>
    %19 = tpu.matmul %17, %18, %cst_14 {dimension_numbers = #tpu.dot_dimension_numbers<[1], [0], [0], [1], [0, 0, 1, 1], [], []>} : vector<8x128xbf16>, vector<128x128xbf16>, vector<8x128xf32> -> vector<8x128xf32>
    %c0_15 = arith.constant 0 : index
    %c0_16 = arith.constant 0 : index
    %20 = vector.load %arg7[%c0_15, %c0_16] : memref<1x128xf32, #tpu.memory_space<vmem>>, vector<1x128xf32>
    %21 = vector.broadcast %20 : vector<1x128xf32> to vector<8x128xf32>
    %22 = arith.addf %19, %21 : vector<8x128xf32>
    %c0_17 = arith.constant 0 : index
    %c0_18 = arith.constant 0 : index
    %23 = vector.load %arg8[%c0_17, %c0_18] : memref<8x128xf32, #tpu.memory_space<vmem>>, vector<8x128xf32>
    tpu.vector_store %arg8[%c0_17, %c0_18], %22 {strides = array<i32>} : memref<8x128xf32, #tpu.memory_space<vmem>>, vector<8x128xf32>,
    return
  }
  func.func @transform_0(%arg0: i32) -> (i32, i32) {
    %c0_i32 = arith.constant 0 : i32
    %c0_i32_0 = arith.constant 0 : i32
    return %arg0, %c0_i32 : i32, i32
  }
  func.func @transform_1(%arg0: i32) -> (i32, i32) {
    %c0_i32 = arith.constant 0 : i32
    %c0_i32_0 = arith.constant 0 : i32
    %c0_i32_1 = arith.constant 0 : i32
    return %c0_i32, %c0_i32_0 : i32, i32
  }
  func.func @transform_2(%arg0: i32) -> (i32, i32) {
    %c0_i32 = arith.constant 0 : i32
    %c0_i32_0 = arith.constant 0 : i32
    %c0_i32_1 = arith.constant 0 : i32
    return %c0_i32, %c0_i32_0 : i32, i32
  }
  func.func @transform_3(%arg0: i32) -> (i32, i32) {
    %c0_i32 = arith.constant 0 : i32
    %c0_i32_0 = arith.constant 0 : i32
    %c0_i32_1 = arith.constant 0 : i32
    return %c0_i32, %c0_i32_0 : i32, i32
  }
  func.func @transform_4(%arg0: i32) -> (i32, i32) {
    %c0_i32 = arith.constant 0 : i32
    %c0_i32_0 = arith.constant 0 : i32
    %c0_i32_1 = arith.constant 0 : i32
    return %c0_i32, %c0_i32_0 : i32, i32
  }
  func.func @transform_5(%arg0: i32) -> (i32, i32) {
    %c0_i32 = arith.constant 0 : i32
    %c0_i32_0 = arith.constant 0 : i32
    %c0_i32_1 = arith.constant 0 : i32
    return %c0_i32, %c0_i32_0 : i32, i32
  }
  func.func @transform_6(%arg0: i32) -> (i32, i32) {
    %c0_i32 = arith.constant 0 : i32
    %c0_i32_0 = arith.constant 0 : i32
    %c0_i32_1 = arith.constant 0 : i32
    return %c0_i32, %c0_i32_0 : i32, i32
  }
  func.func @transform_7(%arg0: i32) -> (i32, i32) {
    %c0_i32 = arith.constant 0 : i32
    %c0_i32_0 = arith.constant 0 : i32
    return %arg0, %c0_i32 : i32, i32
  }
}

</mosaic_0001>

<bundles_post_ra>
// kernel: tpu_custom_call.1
= control target key start
LH: loop header
LB: loop body
LE: loop exit
PB: predicated region body
PF: predicated region fallthrough
CT: control target
= control target key end

     0   :  { %12 = vsyncpa [#allocation3], 0  ;;  %s805_s0 = inlined_call_operand.hbm [shape: f32[8,128], index: 0, kind: input, shape index: {}]   ;;  %s806_s1 = inlined_call_operand.hbm [shape: bf16[128,128], index: 1, kind: input, shape index: {}]   ;;  %s807_s2 = inlined_call_operand.vmem [shape: f32[1,128], index: 2, kind: input, shape index: {}]   ;;  %s808_s3 = inlined_call_operand.hbm [shape: bf16[128,128], index: 3, kind: input, shape index: {}]   ;;  %s809_s4 = inlined_call_operand.vmem [shape: f32[1,128], index: 4, kind: input, shape index: {}]   ;;  %s810_s5 = inlined_call_operand.hbm [shape: bf16[128,128], index: 5, kind: input, shape index: {}]   ;;  %s811_s6 = inlined_call_operand.vmem [shape: f32[1,128], index: 6, kind: input, shape index: {}]   ;;  %s812_s7 = inlined_call_operand.hbm [shape: f32[8,128], index: 7, kind: output, shape index: {}]  }
   0x1   :  { %13 = vsyncpa [#allocation6], 0 }
   0x2   :  { %14 = vsyncpa [#allocation9], 0 }
   0x3   :  { %15 = vsyncpa [#allocation4], 0  ;;  %s693_s24 = smov [#allocation5]  }
   0x4   :  { %s31_s25 = sshll.u32 %s693_s24, 4  ;;  %s32_s25 = int_to_ptr.vmem [resolvable:$true] %s31_s25 }
   0x5   :  { %s593_s26 = scalar_lea.vmem %s32_s25, 1024  ;;  %p598_p1 = scmp.lt.s32.totalorder %s32_s25, %s32_s25 }
   0x6   :  { %p594_p0 = scmp.ne.s32.totalorder %s32_s25, %s593_s26  ;;  %p599_p2 = scmp.lt.s32.totalorder %s593_s26, %s593_s26 }
   0x8   :  { %p600_p3 = por %p599_p2, %p598_p1 }
   0xa   :  { %p601_p4 = pnand %p600_p3, %p594_p0 }
   0xc   :  { %604 = shalt.err (!%p601_p4)
}
   0xd   :  { %s694_s27 = smov 64   ;;  %s695_s28 = smov 4  }
   0xe   :  { %37 = dma.hbm_to_vmem [thread:$0]  %s806_s1, 1024, %s32_s25, [#allocation6], %s694_s27, %s694_s27, %s695_s28  }
   0xf   :  { %s696_s8 = smov [#allocation2]   ;;  %s697_s10 = smov [#allocation7]  }
  0x10   :  { %s22_s9 = sshll.u32 %s696_s8, 4  ;;  %s45_s11 = sshll.u32 %s697_s10, 4  ;;  %s23_s9 = int_to_ptr.vmem [resolvable:$true] %s22_s9  ;;  %s46_s11 = int_to_ptr.vmem [resolvable:$true] %s45_s11 }
  0x11   :  { %s613_s12 = scalar_lea.vmem %s23_s9, 128  ;;  %p618_p6 = scmp.lt.s32.totalorder %s23_s9, %s23_s9 }
  0x12   :  { %p614_p5 = scmp.ne.s32.totalorder %s23_s9, %s613_s12  ;;  %p619_p7 = scmp.lt.s32.totalorder %s613_s12, %s613_s12 }
  0x14   :  { %p620_p8 = por %p619_p7, %p618_p6 }
  0x16   :  { %p621_p9 = pnand %p620_p8, %p614_p5 }
  0x18   :  { %624 = shalt.err (!%p621_p9)
}
  0x19   :  { %25 = dma.hbm_to_vmem [thread:$0]  %s805_s0, 128, %s23_s9, [#allocation3]  }
  0x1a   :  { %s633_s15 = scalar_lea.vmem %s46_s11, 1024  ;;  %p638_p11 = scmp.lt.s32.totalorder %s46_s11, %s46_s11 }
  0x1b   :  { %p634_p10 = scmp.ne.s32.totalorder %s46_s11, %s633_s15  ;;  %p639_p12 = scmp.lt.s32.totalorder %s633_s15, %s633_s15 }
  0x1d   :  { %p640_p13 = por %p639_p12, %p638_p11 }
  0x1f   :  { %p641_p0 = pnand %p640_p13, %p634_p10 }
  0x21   :  { %644 = shalt.err (!%p641_p0)
}
  0x22   :  { %51 = dma.hbm_to_vmem [thread:$0]  %s808_s3, 1024, %s46_s11, [#allocation6], %s694_s27, %s694_s27, %s695_s28  }
  0x23   :  { %s698_s17 = smov [#allocation8]  }
  0x24   :  { %s59_s18 = sshll.u32 %s698_s17, 4  ;;  %s60_s18 = int_to_ptr.vmem [resolvable:$true] %s59_s18 }
  0x25   :  { %s653_s19 = scalar_lea.vmem %s60_s18, 1024  ;;  %p658_p2 = scmp.lt.s32.totalorder %s60_s18, %s60_s18 }
  0x26   :  { %p654_p1 = scmp.ne.s32.totalorder %s60_s18, %s653_s19  ;;  %p659_p3 = scmp.lt.s32.totalorder %s653_s19, %s653_s19 }
  0x28   :  { %p660_p4 = por %p659_p3, %p658_p2 }
  0x2a   :  { %p661_p5 = pnand %p660_p4, %p654_p1 }
  0x2c   :  { %664 = shalt.err (!%p661_p5)
}
  0x2d   :  { %65 = dma.hbm_to_vmem [thread:$0]  %s810_s5, 1024, %s60_s18, [#allocation9], %s694_s27, %s694_s27, %s695_s28  }
  0x2e   :  { %685 = dma.done.wait [#allocation3], 128  }
  0x2f   :  { %686 = vsyncadd [#allocation3], 4294967168 }
  0x30   :  { %687 = dma.done.wait [#allocation6], 2048  }
  0x31   :  { %688 = vsyncadd [#allocation6], 4294965248 }
  0x32   :  { %689 = dma.done.wait [#allocation9], 1024  }
  0x33   :  { %690 = vsyncadd [#allocation9], 4294966272  ;;  %v699_v0 = vmov 0.0   ;;  %vm700_vm0 = vmmov 0   ;;  %v561_v1 = vld [vmem:[#allocation5 + $0x38] sm:$0xff]   ;;  %v562_v2 = vld [vmem:[#allocation5 + $0x30] sm:$0xff]  }
  0x34   :  { %492 = vmatprep.subr.bf16.mxu0 %v699_v0  ;;  %508 = vmatprep.mubr.msk.bf16.mxu0 %vm700_vm0, %v699_v0  ;;  %v563_v3 = vld [vmem:[#allocation5 + $0x28] sm:$0xff]   ;;  %v569_v4 = vld [vmem:[#allocation7 + $0x38] sm:$0xff]   ;;  %v564_v5 = vld [vmem:[#allocation5 + $0x20] sm:$0xff]   ;;  %s701_s24 = smov [#allocation10]  }
  0x35   :  { %512 = vmatprep.subr.bf16.mxu1 %v699_v0  ;;  %528 = vmatprep.mubr.msk.bf16.mxu1 %vm700_vm0, %v699_v0  ;;  %v570_v6 = vld [vmem:[#allocation7 + $0x30] sm:$0xff]   ;;  %v565_v7 = vld [vmem:[#allocation5 + $0x18] sm:$0xff]   ;;  %v571_v8 = vld [vmem:[#allocation7 + $0x28] sm:$0xff]   ;;  %s427_s25 = sshll.u32 %s701_s24, 4  ;;  %s428_s25 = int_to_ptr.vmem [resolvable:$true] %s427_s25 }
  0x36   :  { %493 = vmatpush3.bf16.msra.mxu0 %v561_v1  ;;  %513 = vmatpush3.bf16.msra.mxu1 %v569_v4  ;;  %v566_v9 = vld [vmem:[#allocation5 + $0x10] sm:$0xff]   ;;  %v572_v10 = vld [vmem:[#allocation7 + $0x20] sm:$0xff]   ;;  %v567_v11 = vld [vmem:[#allocation5 + $0x8] sm:$0xff]   ;;  %p670_p7 = scmp.lt.s32.totalorder %s428_s25, %s428_s25 }
  0x37   :  { %494 = vmatprep.subr.bf16.mxu0 %v699_v0  ;;  %514 = vmatprep.subr.bf16.mxu1 %v699_v0  ;;  %v573_v12 = vld [vmem:[#allocation7 + $0x18] sm:$0xff]   ;;  %v568_v13 = vld [vmem:[#allocation5] sm:$0xff]   ;;  %v574_v15 = vld [vmem:[#allocation7 + $0x10] sm:$0xff]  }
  0x38   :  { %v81_v14 = vld [vmem:[#allocation2] sm:$0xff]  ;;  %v575_v17 = vld [vmem:[#allocation7 + $0x8] sm:$0xff]   ;;  %v576_v18 = vld [vmem:[#allocation7] sm:$0xff]  }
  0x39   :  { %v82_v16 = vpack.c.bf16 %v81_v14, %v81_v14  ;;  %v577_v19 = vld [vmem:[#allocation8 + $0x38] sm:$0xff]   ;;  %v578_v20 = vld [vmem:[#allocation8 + $0x30] sm:$0xff]   ;;  %v579_v21 = vld [vmem:[#allocation8 + $0x28] sm:$0xff]  }
  0x3a   :  { %495 = vmatpush3.bf16.msra.mxu0 %v562_v2  ;;  %515 = vmatpush3.bf16.msra.mxu1 %v570_v6  ;;  %v580_v22 = vld [vmem:[#allocation8 + $0x20] sm:$0xff]   ;;  %v581_v23 = vld [vmem:[#allocation8 + $0x18] sm:$0xff]   ;;  %v582_v24 = vld [vmem:[#allocation8 + $0x10] sm:$0xff]  }
  0x3b   :  { %496 = vmatprep.subr.bf16.mxu0 %v699_v0  ;;  %516 = vmatprep.subr.bf16.mxu1 %v699_v0  ;;  %v438_v25 = vld [vmem:[%s807_s2] ss:$0 sm:$0xff]  ;;  %v583_v33 = vld [vmem:[#allocation8 + $0x8] sm:$0xff]   ;;  %v584_v34 = vld [vmem:[#allocation8] sm:$0xff]  }
  0x3c   :  { %v447_v35 = vld [vmem:[%s809_s4] ss:$0 sm:$0xff]  ;;  %s665_s4 = scalar_lea.vmem %s428_s25, 128 }
  0x3d   :  { %v456_v43 = vld [vmem:[%s811_s6] ss:$0 sm:$0xff]  ;;  %p666_p6 = scmp.ne.s32.totalorder %s428_s25, %s665_s4  ;;  %p671_p8 = scmp.lt.s32.totalorder %s665_s4, %s665_s4 }
  0x3e   :  { %497 = vmatpush3.bf16.msra.mxu0 %v563_v3  ;;  %517 = vmatpush3.bf16.msra.mxu1 %v571_v8 }
  0x3f   :  { %498 = vmatprep.subr.bf16.mxu0 %v699_v0  ;;  %518 = vmatprep.subr.bf16.mxu1 %v699_v0  ;;  %p672_p9 = por %p671_p8, %p670_p7 }
  0x41   :  { %p673_p10 = pnand %p672_p9, %p666_p6 }
  0x42   :  { %499 = vmatpush3.bf16.msra.mxu0 %v564_v5  ;;  %519 = vmatpush3.bf16.msra.mxu1 %v572_v10 }
  0x43   :  { %500 = vmatprep.subr.bf16.mxu0 %v699_v0  ;;  %520 = vmatprep.subr.bf16.mxu1 %v699_v0 }
  0x46   :  { %501 = vmatpush3.bf16.msra.mxu0 %v565_v7  ;;  %521 = vmatpush3.bf16.msra.mxu1 %v573_v12 }
  0x47   :  { %502 = vmatprep.subr.bf16.mxu0 %v699_v0  ;;  %522 = vmatprep.subr.bf16.mxu1 %v699_v0 }
  0x4a   :  { %503 = vmatpush3.bf16.msra.mxu0 %v566_v9  ;;  %523 = vmatpush3.bf16.msra.mxu1 %v574_v15 }
  0x4b   :  { %504 = vmatprep.subr.bf16.mxu0 %v699_v0  ;;  %524 = vmatprep.subr.bf16.mxu1 %v699_v0 }
  0x4e   :  { %505 = vmatpush3.bf16.msra.mxu0 %v567_v11  ;;  %525 = vmatpush3.bf16.msra.mxu1 %v575_v17 }
  0x4f   :  { %506 = vmatprep.subr.bf16.mxu0 %v699_v0  ;;  %526 = vmatprep.subr.bf16.mxu1 %v699_v0 }
  0x52   :  { %507 = vmatpush3.bf16.msra.mxu0 %v568_v13  ;;  %527 = vmatpush3.bf16.msra.mxu1 %v576_v18 }
  0x53   :  { %532 = vmatprep.subr.bf16.mxu0 %v699_v0 }
  0x55   :  { %509 = vmatmul.mubr.bf16.vlgmr.msra.gmra.mxu0 %v82_v16 }
  0x56   :  { %548 = vmatprep.mubr.msk.bf16.mxu0 %vm700_vm0, %v699_v0  ;;  %533 = vmatpush3.bf16.msra.mxu0 %v577_v19 }
  0x57   :  { %534 = vmatprep.subr.bf16.mxu0 %v699_v0 }
  0x5a   :  { %535 = vmatpush3.bf16.msra.mxu0 %v578_v20 }
  0x5b   :  { %536 = vmatprep.subr.bf16.mxu0 %v699_v0 }
  0x5e   :  { %537 = vmatpush3.bf16.msra.mxu0 %v579_v21 }
  0x5f   :  { %538 = vmatprep.subr.bf16.mxu0 %v699_v0 }
  0x62   :  { %539 = vmatpush3.bf16.msra.mxu0 %v580_v22 }
  0x63   :  { %540 = vmatprep.subr.bf16.mxu0 %v699_v0 }
  0x66   :  { %541 = vmatpush3.bf16.msra.mxu0 %v581_v23 }
  0x67   :  { %542 = vmatprep.subr.bf16.mxu0 %v699_v0 }
  0x6a   :  { %543 = vmatpush3.bf16.msra.mxu0 %v582_v24 }
  0x6b   :  { %544 = vmatprep.subr.bf16.mxu0 %v699_v0 }
  0x6e   :  { %545 = vmatpush3.bf16.msra.mxu0 %v583_v33 }
  0x6f   :  { %546 = vmatprep.subr.bf16.mxu0 %v699_v0 }
  0x72   :  { %547 = vmatpush3.bf16.msra.mxu0 %v584_v34 }
 0x115   :  { %v188_v26 = vpop.f32.mrf.mxu0 }
 0x116   :  { %v189_v27 = vadd.f32 %v438_v25, %v188_v26 }
 0x117   :  { %v510_v28 = vpop.f32.mrf.mxu0 }
 0x118   :  { %v194_v29 = vmax.f32 %v189_v27, 0.0 }
 0x119   :  { %v191_v30 = vpop.f32.mrf.mxu0 }
 0x11a   :  { %v195_v31 = vpack.c.bf16 %v194_v29, %v194_v29 }
 0x11b   :  { %v511_v32 = vpop.f32.mrf.mxu0 }
 0x11c   :  { %529 = vmatmul.mubr.bf16.vlgmr.msra.gmra.mxu1 %v195_v31 }
 0x1dc   :  { %v301_v36 = vpop.f32.mrf.mxu1 }
 0x1dd   :  { %v302_v37 = vadd.f32 %v447_v35, %v301_v36 }
 0x1de   :  { %v530_v38 = vpop.f32.mrf.mxu1 }
 0x1df   :  { %v307_v39 = vmax.f32 %v302_v37, 0.0 }
 0x1e0   :  { %v304_v40 = vpop.f32.mrf.mxu1 }
 0x1e1   :  { %v308_v41 = vpack.c.bf16 %v307_v39, %v307_v39 }
 0x1e2   :  { %v531_v42 = vpop.f32.mrf.mxu1 }
 0x1e3   :  { %549 = vmatmul.mubr.bf16.vlgmr.msra.gmra.mxu0 %v308_v41 }
 0x2a3   :  { %v414_v44 = vpop.f32.mrf.mxu0 }
 0x2a4   :  { %v415_v45 = vadd.f32 %v456_v43, %v414_v44 }
 0x2a5   :  { %v550_v46 = vpop.f32.mrf.mxu0 }
 0x2a6   :  { %420 = vst [vmem:[#allocation10] sm:$0xff] %v415_v45 }
 0x2a7   :  { %v417_v47 = vpop.f32.mrf.mxu0 }
 0x2a8   :  { %676 = shalt.err (!%p673_p10)
}
 0x2a9   :  { %430 = dma.vmem_to_hbm [thread:$0]  %s428_s25, 128, %s812_s7, [#allocation4]   ;;  %v551_v48 = vpop.f32.mrf.mxu0 }
 0x2aa   :  { %691 = dma.done.wait [#allocation4], 128  }
 0x2ab   :  { %692 = vsyncadd [#allocation4], 4294967168 }
 0x2ac   :  { %434 = vsyncpa [#allocation3], 1 }
 0x2ad   :  { %435 = vsyncpa [#allocation6], 1 }
 0x2ae   :  { %436 = vsyncpa [#allocation9], 1 }
 0x2af   :  { %437 = vsyncpa [#allocation4], 1 }

</bundles_post_ra>
